<compile_context>
chip_gen: v6e
topology: v6e:2x2x1
jax: 0.10.0
libtpu: 0.0.40
codegen_flags: <defaults>
</compile_context>

<pallas_src>
import functools

import jax
import jax.numpy as jnp
from jax.experimental import pallas as pl
from jax.experimental.pallas import tpu as pltpu


def _residual_kernel(x_ref, w_ref, b_ref, o_ref, rhs_ref, *, taps_off, hwp, cin):
    """Fused (3x3 'same' conv + bias) + (1x1 shortcut, folded into centre tap).

    x_ref  : (BN, Cin, SLAB)    zero-padded flat image slabs, f32
    w_ref  : (Cout, 9*Cin)      im2col weight matrix (tap-major columns), f32
    b_ref  : (Cout, 1)          main-conv bias, f32
    o_ref  : (BN, Cout, H*Wp)   output slabs (2 garbage cols per row, sliced in wrapper)
    rhs_ref: (9*Cin, H*Wp)      VMEM scratch: im2col patch matrix for one image
    """
    BN = x_ref.shape[0]
    Cout = o_ref.shape[1]

    # Hoisted once per grid step: resident weights + broadcast bias.
    w = w_ref[...]
    bias = jnp.broadcast_to(b_ref[...], (Cout, hwp))

    for b in range(BN):
        slab = x_ref[b]                                    # (Cin, SLAB), one load per image
        # Assemble the (9*Cin, H*Wp) patch matrix from 9 *contiguous* static slices.
        for t, off in enumerate(taps_off):
            rhs_ref[t * cin:(t + 1) * cin, :] = slab[:, off:off + hwp]
        # Single matmul per image: (Cout, 9*Cin) @ (9*Cin, H*Wp), f32 accumulation.
        acc = bias + jnp.dot(w, rhs_ref[...], preferred_element_type=jnp.float32)
        o_ref[b] = acc.astype(o_ref.dtype)


def _pick_block_n(n):
    # Keep >= 2 grid steps whenever possible so dimension_semantics=("parallel",)
    # can shard across both v7x TensorCores; cap the static in-kernel unroll at 8
    # images (per-image VMEM footprint is ~15 KB, so the unroll cap binds long
    # before any VMEM limit does).
    cap = max(1, min(8, n // 2))
    for bn in range(cap, 0, -1):
        if n % bn == 0:
            return bn
    return 1


@jax.jit
def residual_forward(x, w_main, b_main, w_short):
    """x: (N, Cin, H, W) f32; w_main: (Cout, Cin, 3, 3); b_main: (Cout,);
    w_short: (Cout, Cin, 1, 1)  ->  (N, Cout, H, W) f32."""
    N, Cin, H, W = x.shape
    Cout = w_main.shape[0]
    Hp, Wp = H + 2, W + 2
    HWp = H * Wp                                  # matmul lane dim (incl. 2 garbage cols/row)
    # Flat-slab length: last tap (di=dj=2) reads up to 2*Wp+2 + H*Wp; round up to 128 lanes.
    slab_len = -(-(HWp + 2 * Wp + 2) // 128) * 128

    BN = _pick_block_n(N)

    # Spatial zero-pad, flatten to a per-image slab, pad the lane tail (channels-first,
    # no NCHW<->NHWC transposes anywhere).
    x_pad = jnp.pad(x, ((0, 0), (0, 0), (1, 1), (1, 1)))
    x_slab = jnp.pad(x_pad.reshape(N, Cin, Hp * Wp),
                     ((0, 0), (0, 0), (0, slab_len - Hp * Wp))).astype(jnp.float32)

    # Fold the 1x1 shortcut into the centre tap, then OIHW -> (Cout, 9*Cin) im2col matrix.
    # Column index = (di*3 + dj)*Cin + c, matching the tap-major RHS rows built in-kernel.
    w_fold = w_main.at[:, :, 1, 1].add(w_short[:, :, 0, 0])
    w_mat = jnp.transpose(w_fold, (0, 2, 3, 1)).reshape(Cout, 9 * Cin).astype(jnp.float32)
    b_col = b_main.reshape(Cout, 1).astype(jnp.float32)

    taps_off = tuple(di * Wp + dj for di in range(3) for dj in range(3))
    kernel = functools.partial(_residual_kernel, taps_off=taps_off, hwp=HWp, cin=Cin)

    out = pl.pallas_call(
        kernel,
        out_shape=jax.ShapeDtypeStruct((N, Cout, HWp), x.dtype),
        grid_spec=pltpu.PrefetchScalarGridSpec(
            num_scalar_prefetch=0,
            grid=(N // BN,),
            in_specs=[
                pl.BlockSpec((BN, Cin, slab_len), lambda n: (n, 0, 0)),
                pl.BlockSpec((Cout, 9 * Cin), lambda n: (0, 0)),   # resident weights
                pl.BlockSpec((Cout, 1), lambda n: (0, 0)),         # resident bias
            ],
            out_specs=pl.BlockSpec((BN, Cout, HWp), lambda n: (n, 0, 0)),
            scratch_shapes=[pltpu.VMEM((9 * Cin, HWp), jnp.float32)],
        ),
        compiler_params=pltpu.CompilerParams(
            dimension_semantics=("parallel",),
            # Blocks are KB-scale; 32 MiB is safe on v7x (64 MiB physical VMEM) and ample here.
            vmem_limit_bytes=32 * 1024 * 1024,
        ),
    )(x_slab, w_mat, b_col)

    # (N, Cout, H*Wp): drop the 2 wrap-around columns per row -> (N, Cout, H, W).
    return out.reshape(N, Cout, H, Wp)[:, :, :, :W]


def _reference(x, w_main, b_main, w_short):
    """Pure-JAX f32 reference (lax conv) of Residual.forward."""
    dn = jax.lax.conv_dimension_numbers(x.shape, w_main.shape, ("NCHW", "OIHW", "NCHW"))
    main = jax.lax.conv_general_dilated(
        x, w_main, window_strides=(1, 1), padding="SAME", dimension_numbers=dn,
        precision=jax.lax.Precision.HIGHEST) + b_main.reshape(1, -1, 1, 1)
    short = jax.lax.conv_general_dilated(
        x, w_short, window_strides=(1, 1), padding="VALID", dimension_numbers=dn,
        precision=jax.lax.Precision.HIGHEST)
    return main + short


if __name__ == "__main__":
    N, Cin, Cout, H, W = 2, 4, 8, 16, 16

    key = jax.random.PRNGKey(0)
    kx, kw_main, kb_main, kw_short = jax.random.split(key, 4)

    x = jax.random.normal(kx, (N, Cin, H, W), dtype=jnp.float32)

    # main: Conv2d(Cin, Cout, 3, padding=1, bias=True), deterministic init.
    fan_in_main = Cin * 3 * 3
    w_main = jax.random.normal(kw_main, (Cout, Cin, 3, 3),
                               dtype=jnp.float32) * (2.0 / fan_in_main) ** 0.5
    b_main = jax.random.normal(kb_main, (Cout,), dtype=jnp.float32) * 0.01

    # shortcut: Conv2d(Cin, Cout, 1, bias=False), kaiming_normal (fan_in = Cin).
    w_short = jax.random.normal(kw_short, (Cout, Cin, 1, 1),
                                dtype=jnp.float32) * (2.0 / Cin) ** 0.5

    out = residual_forward(x, w_main, b_main, w_short)
    jax.block_until_ready(out)
    assert out.shape == (N, Cout, H, W)

    # Correctness vs the f32 module semantics.  Operands are kept in f32; tolerance
    # covers the MXU's internal f32 matmul pass policy across generations.
    ref = _reference(x, w_main, b_main, w_short)
    max_err = jnp.max(jnp.abs(out - ref))
    assert jnp.allclose(out, ref, atol=2e-2, rtol=2e-2), f"mismatch vs f32 reference (max err {max_err})"

    print("KERNEL_OK")
</pallas_src>

<mosaic_0001>
module attributes {stable_mosaic.version = 11 : i64} {
  func.func @_residual_kernel(%arg0: i32, %arg1: memref<1x4x384xf32, #tpu.memory_space<vmem>>, %arg2: memref<8x36xf32, #tpu.memory_space<vmem>>, %arg3: memref<8x1xf32, #tpu.memory_space<vmem>>, %arg4: memref<1x8x288xf32, #tpu.memory_space<vmem>>, %arg5: memref<36x288xf32, #tpu.memory_space<vmem>>) attributes {dimension_semantics = [#tpu.dimension_semantics<parallel>], iteration_bounds = array<i64: 2>, scalar_prefetch = 0 : i64, scratch_operands = 1 : i64, tpu.core_type = #tpu.core_type<tc>, window_params = [{transform_indices = @transform_0, window_bounds = array<i64: 1, 4, 384>}, {pipeline_mode = #tpu.pipeline_mode<synchronous>, transform_indices = @transform_1, window_bounds = array<i64: 8, 36>}, {pipeline_mode = #tpu.pipeline_mode<synchronous>, transform_indices = @transform_2, window_bounds = array<i64: 8, 1>}, {transform_indices = @transform_3, window_bounds = array<i64: 1, 8, 288>}]} {
    %c0 = arith.constant 0 : index
    %c0_0 = arith.constant 0 : index
    %0 = vector.load %arg2[%c0, %c0_0] : memref<8x36xf32, #tpu.memory_space<vmem>>, vector<8x36xf32>
    %c0_1 = arith.constant 0 : index
    %c0_2 = arith.constant 0 : index
    %1 = vector.load %arg3[%c0_1, %c0_2] : memref<8x1xf32, #tpu.memory_space<vmem>>, vector<8x1xf32>
    %2 = vector.shape_cast %1 : vector<8x1xf32> to vector<8x1xf32>
    %3 = vector.broadcast %2 : vector<8x1xf32> to vector<8x288xf32>
    %c0_3 = arith.constant 0 : index
    %c0_4 = arith.constant 0 : index
    %c0_5 = arith.constant 0 : index
    %4 = vector.load %arg1[%c0_3, %c0_4, %c0_5] : memref<1x4x384xf32, #tpu.memory_space<vmem>>, vector<1x4x384xf32>
    %5 = vector.shape_cast %4 : vector<1x4x384xf32> to vector<4x384xf32>
    %6 = vector.extract_strided_slice %5 {offsets = [0, 0], sizes = [4, 288], strides = [1, 1]} : vector<4x384xf32> to vector<4x288xf32>
    %c0_6 = arith.constant 0 : index
    %c0_7 = arith.constant 0 : index
    %7 = vector.load %arg5[%c0_6, %c0_7] : memref<36x288xf32, #tpu.memory_space<vmem>>, vector<4x288xf32>
    tpu.vector_store %arg5[%c0_6, %c0_7], %6 {strides = array<i32>} : memref<36x288xf32, #tpu.memory_space<vmem>>, vector<4x288xf32>,
    %8 = vector.extract_strided_slice %5 {offsets = [0, 1], sizes = [4, 288], strides = [1, 1]} : vector<4x384xf32> to vector<4x288xf32>
    %c4 = arith.constant 4 : index
    %c0_8 = arith.constant 0 : index
    %9 = vector.load %arg5[%c4, %c0_8] : memref<36x288xf32, #tpu.memory_space<vmem>>, vector<4x288xf32>
    tpu.vector_store %arg5[%c4, %c0_8], %8 {strides = array<i32>} : memref<36x288xf32, #tpu.memory_space<vmem>>, vector<4x288xf32>,
    %10 = vector.extract_strided_slice %5 {offsets = [0, 2], sizes = [4, 288], strides = [1, 1]} : vector<4x384xf32> to vector<4x288xf32>
    %c8 = arith.constant 8 : index
    %c0_9 = arith.constant 0 : index
    %11 = vector.load %arg5[%c8, %c0_9] : memref<36x288xf32, #tpu.memory_space<vmem>>, vector<4x288xf32>
    tpu.vector_store %arg5[%c8, %c0_9], %10 {strides = array<i32>} : memref<36x288xf32, #tpu.memory_space<vmem>>, vector<4x288xf32>,
    %12 = vector.extract_strided_slice %5 {offsets = [0, 18], sizes = [4, 288], strides = [1, 1]} : vector<4x384xf32> to vector<4x288xf32>
    %c12 = arith.constant 12 : index
    %c0_10 = arith.constant 0 : index
    %13 = vector.load %arg5[%c12, %c0_10] : memref<36x288xf32, #tpu.memory_space<vmem>>, vector<4x288xf32>
    tpu.vector_store %arg5[%c12, %c0_10], %12 {strides = array<i32>} : memref<36x288xf32, #tpu.memory_space<vmem>>, vector<4x288xf32>,
    %14 = vector.extract_strided_slice %5 {offsets = [0, 19], sizes = [4, 288], strides = [1, 1]} : vector<4x384xf32> to vector<4x288xf32>
    %c16 = arith.constant 16 : index
    %c0_11 = arith.constant 0 : index
    %15 = vector.load %arg5[%c16, %c0_11] : memref<36x288xf32, #tpu.memory_space<vmem>>, vector<4x288xf32>
    tpu.vector_store %arg5[%c16, %c0_11], %14 {strides = array<i32>} : memref<36x288xf32, #tpu.memory_space<vmem>>, vector<4x288xf32>,
    %16 = vector.extract_strided_slice %5 {offsets = [0, 20], sizes = [4, 288], strides = [1, 1]} : vector<4x384xf32> to vector<4x288xf32>
    %c20 = arith.constant 20 : index
    %c0_12 = arith.constant 0 : index
    %17 = vector.load %arg5[%c20, %c0_12] : memref<36x288xf32, #tpu.memory_space<vmem>>, vector<4x288xf32>
    tpu.vector_store %arg5[%c20, %c0_12], %16 {strides = array<i32>} : memref<36x288xf32, #tpu.memory_space<vmem>>, vector<4x288xf32>,
    %18 = vector.extract_strided_slice %5 {offsets = [0, 36], sizes = [4, 288], strides = [1, 1]} : vector<4x384xf32> to vector<4x288xf32>
    %c24 = arith.constant 24 : index
    %c0_13 = arith.constant 0 : index
    %19 = vector.load %arg5[%c24, %c0_13] : memref<36x288xf32, #tpu.memory_space<vmem>>, vector<4x288xf32>
    tpu.vector_store %arg5[%c24, %c0_13], %18 {strides = array<i32>} : memref<36x288xf32, #tpu.memory_space<vmem>>, vector<4x288xf32>,
    %20 = vector.extract_strided_slice %5 {offsets = [0, 37], sizes = [4, 288], strides = [1, 1]} : vector<4x384xf32> to vector<4x288xf32>
    %c28 = arith.constant 28 : index
    %c0_14 = arith.constant 0 : index
    %21 = vector.load %arg5[%c28, %c0_14] : memref<36x288xf32, #tpu.memory_space<vmem>>, vector<4x288xf32>
    tpu.vector_store %arg5[%c28, %c0_14], %20 {strides = array<i32>} : memref<36x288xf32, #tpu.memory_space<vmem>>, vector<4x288xf32>,
    %22 = vector.extract_strided_slice %5 {offsets = [0, 38], sizes = [4, 288], strides = [1, 1]} : vector<4x384xf32> to vector<4x288xf32>
    %c32 = arith.constant 32 : index
    %c0_15 = arith.constant 0 : index
    %23 = vector.load %arg5[%c32, %c0_15] : memref<36x288xf32, #tpu.memory_space<vmem>>, vector<4x288xf32>
    tpu.vector_store %arg5[%c32, %c0_15], %22 {strides = array<i32>} : memref<36x288xf32, #tpu.memory_space<vmem>>, vector<4x288xf32>,
    %c0_16 = arith.constant 0 : index
    %c0_17 = arith.constant 0 : index
    %24 = vector.load %arg5[%c0_16, %c0_17] : memref<36x288xf32, #tpu.memory_space<vmem>>, vector<36x288xf32>
    %cst = arith.constant dense<0.000000e+00> : vector<8x288xf32>
    %25 = tpu.matmul %0, %24, %cst {dimension_numbers = #tpu.dot_dimension_numbers<[1], [0], [0], [1], [0, 0, 1, 1], [], []>} : vector<8x36xf32>, vector<36x288xf32>, vector<8x288xf32> -> vector<8x288xf32>
    %26 = arith.addf %3, %25 : vector<8x288xf32>
    %c0_18 = arith.constant 0 : index
    %c0_19 = arith.constant 0 : index
    %c0_20 = arith.constant 0 : index
    %27 = vector.load %arg4[%c0_18, %c0_19, %c0_20] : memref<1x8x288xf32, #tpu.memory_space<vmem>>, vector<1x8x288xf32>
    %28 = vector.shape_cast %27 : vector<1x8x288xf32> to vector<8x288xf32>
    %29 = vector.shape_cast %26 : vector<8x288xf32> to vector<1x8x288xf32>
    tpu.vector_store %arg4[%c0_18, %c0_19, %c0_20], %29 {strides = array<i32>} : memref<1x8x288xf32, #tpu.memory_space<vmem>>, vector<1x8x288xf32>,
    return
  }
  func.func @transform_0(%arg0: i32) -> (i32, i32, i32) {
    %c0_i32 = arith.constant 0 : i32
    %c0_i32_0 = arith.constant 0 : i32
    %c0_i32_1 = arith.constant 0 : i32
    return %arg0, %c0_i32, %c0_i32_0 : i32, i32, i32
  }
  func.func @transform_1(%arg0: i32) -> (i32, i32) {
    %c0_i32 = arith.constant 0 : i32
    %c0_i32_0 = arith.constant 0 : i32
    %c0_i32_1 = arith.constant 0 : i32
    return %c0_i32, %c0_i32_0 : i32, i32
  }
  func.func @transform_2(%arg0: i32) -> (i32, i32) {
    %c0_i32 = arith.constant 0 : i32
    %c0_i32_0 = arith.constant 0 : i32
    %c0_i32_1 = arith.constant 0 : i32
    return %c0_i32, %c0_i32_0 : i32, i32
  }
  func.func @transform_3(%arg0: i32) -> (i32, i32, i32) {
    %c0_i32 = arith.constant 0 : i32
    %c0_i32_0 = arith.constant 0 : i32
    %c0_i32_1 = arith.constant 0 : i32
    return %arg0, %c0_i32, %c0_i32_0 : i32, i32, i32
  }
}

</mosaic_0001>

<bundles_post_ra>
// kernel: residual_forward.1
= control target key start
LH: loop header
LB: loop body
LE: loop exit
PB: predicated region body
PF: predicated region fallthrough
CT: control target
= control target key end

     0   :  { %s640_s12 = smov 0   ;;  %s688_s0 = inlined_call_operand.vmem [shape: f32[2,4,384], index: 0, kind: input, shape index: {}]   ;;  %s689_s1 = inlined_call_operand.vmem [shape: f32[8,36], index: 1, kind: input, shape index: {}]   ;;  %s690_s2 = inlined_call_operand.vmem [shape: f32[8,1], index: 2, kind: input, shape index: {}]   ;;  %s691_s3 = inlined_call_operand.vmem [shape: f32[2,8,288], index: 3, kind: output, shape index: {}]  }
   0x1 LB: > { %s543_s13 = sadd.s32 4294967295, %s607_s12   ;;  %p547_p0 = scmp.ge.s32.totalorder %s607_s12, 1  ;;  %s607_s12 = sphi %s640_s12, %s13_s12  }
   0x2   : > { %p137_p1 = scmp.lt.s32.totalorder %s607_s12, 3 }
   0x4   : > { %p138_p2 = pnand %p547_p0, %p137_p1 }
   0x5   : > { %p161_p3 = scmp.lt.s32.totalorder (!%p138_p2), %s543_s13, 1  ;;  %s610_s18 = smov (!%p138_p2), 90  }
   0x6   : > { %141 = sbr.rel (%p138_p2) target bundleno = 384 (0x180), region = 32  ;;  %s611_s19 = smov (!%p138_p2), 92  }
   0x7   : > { %s612_s20 = smov (!%p138_p2), 91   ;;  %s613_s21 = smov (!%p138_p2), 109  }
   0x8   : > { %s614_s22 = smov (!%p138_p2), 108   ;;  %s615_s23 = smov (!%p138_p2), 126  }
   0x9   : > { %s616_s24 = smov (!%p138_p2), 110   ;;  %s617_s25 = smov (!%p138_p2), 127  }
   0xb   : > { %v609_v0 = vmov 0.0   ;;  %s693_s13 = smov (!%p161_p3, %s543_s13), 1  ;;  %vm186_vm0 = vcmask 257024   ;;  %vm618_vm1 = vmmov 0   ;;  %v619_v6 = vmov 0   ;;  %v172_v7 = vld [vmem:[%s690_s2] sm:$0xff] }
   0xc   : > { %563 = vmatprep.subr.mxu1 %v609_v0  ;;  %404 = vmatprep.mubr.f32.mxu0 %v609_v0  ;;  %s576_s14 = smul.u32 12, %s693_s13  ;;  %vm272_vm2 = vcmask 752640   ;;  %vm302_vm3 = vcmask 736256   ;;  %vm330_vm4 = vcmask 1043456   ;;  %vm204_vm5 = vcmask 261124   ;;  %v171_v60 = vld [vmem:[%s689_s1] sm:$0xff] }
   0xd   : > { %573 = vmatprep.mubr.msk.f32.mxu1 %vm618_vm1, %v609_v0  ;;  %597 = vset.pattern.permute.xlu0 %v619_v6  ;;  %vm287_vm6 = vcmask 744448   ;;  %vm242_vm7 = vcmask 891904   ;;  %vm257_vm8 = vcmask 883712   ;;  %vm212_vm9 = vcmask 1031168   ;;  %s577_s30 = smul.u32 24, %s693_s13 }
   0xe   : > { %s165_s17 = scalar_lea.vmem %s688_s0, %s576_s14  ;;  %vm227_vm10 = vcmask 900096   ;;  %vm196_vm11 = vcmask 1039360   ;;  %vm326_vm12 = vcmask 293888   ;;  %vm486_vm13 = vcmask 261120  }
   0xf   : > { %v179_v1 = vld [vmem:[%s165_s17 + $0x8] sm:$0xf]  ;;  %v178_v2 = vld [vmem:[%s165_s17] sm:$0xff]  ;;  %s170_s6 = scalar_lea.vmem %s691_s3, %s577_s30 }
  0x10   : > { %300 = vrot.lane.b32.xlu0 %v179_v1, %s610_s18  ;;  %184 = vst [vmem:[#allocation2] sm:$0xf] %v178_v2  ;;  %296 = vrot.lane.b32.xlu1 %v178_v2, %s610_s18  ;;  %v182_v3 = vcombine.high %v178_v2, %v178_v2  ;;  %187 = vst.msk [vmem:[#allocation2 + $0x10] sm:$0xf] %vm186_vm0, %v179_v1  ;;  %v189_v4 = vcombine.low %v179_v1, %v179_v1 }
  0x11   : > { %v188_v5 = vcombine.low %v178_v2, %v178_v2 }
  0x12   : > { %185 = vst [vmem:[#allocation2 + $0x8] sm:$0xf] %v182_v3 }
  0x14   : > { %270 = vrot.lane.b32.xlu0 %v179_v1, %s611_s19  ;;  %283 = vrot.lane.b32.xlu1 %v178_v2, %s612_s20 }
  0x18   : > { %268 = vrot.lane.b32.xlu1 %v182_v3, %s611_s19  ;;  %298 = vrot.lane.b32.xlu0 %v182_v3, %s610_s18 }
  0x1c   : > { %266 = vrot.lane.b32.xlu1 %v178_v2, %s611_s19  ;;  %285 = vrot.lane.b32.xlu0 %v189_v4, %s612_s20 }
  0x20   : > { %238 = vrot.lane.b32.xlu1 %v182_v3, %s613_s21  ;;  %281 = vrot.lane.b32.xlu0 %v188_v5, %s612_s20 }
  0x24   : > { %253 = vrot.lane.b32.xlu1 %v178_v2, %s614_s22  ;;  %240 = vrot.lane.b32.xlu0 %v179_v1, %s613_s21 }
  0x28   : > { %236 = vrot.lane.b32.xlu1 %v178_v2, %s613_s21  ;;  %255 = vrot.lane.b32.xlu0 %v189_v4, %s614_s22 }
  0x2c   : > { %208 = vrot.lane.b32.xlu1 %v182_v3, %s615_s23  ;;  %251 = vrot.lane.b32.xlu0 %v188_v5, %s614_s22 }
  0x30   : > { %223 = vrot.lane.b32.xlu1 %v178_v2, %s616_s24  ;;  %210 = vrot.lane.b32.xlu0 %v179_v1, %s615_s23 }
  0x34   : > { %206 = vrot.lane.b32.xlu1 %v178_v2, %s615_s23  ;;  %225 = vrot.lane.b32.xlu0 %v189_v4, %s616_s24 }
  0x38   : > { %192 = vrot.lane.b32.xlu1 %v178_v2, %s617_s25  ;;  %221 = vrot.lane.b32.xlu0 %v188_v5, %s616_s24 }
  0x3c   : > { %190 = vrot.lane.b32.xlu1 %v188_v5, %s617_s25  ;;  %194 = vrot.lane.b32.xlu0 %v189_v4, %s617_s25 }
  0x40   : > { %175 = vperm.xlu0 %597, %v172_v7  }
  0x82   : > { %v301_v8 = vpop.permute.xlu0 %300  ;;  %v297_v9 = vpop.permute.xlu1 %296 }
  0x83   : > { %310 = vst.msk [vmem:[#allocation2 + $0x70] sm:$0xf] %vm186_vm0, %v301_v8 }
  0x86   : > { %v271_v10 = vpop.permute.xlu0 %270  ;;  %v284_v11 = vpop.permute.xlu1 %283 }
  0x87   : > { %280 = vst.msk [vmem:[#allocation2 + $0x58] sm:$0xf] %vm186_vm0, %v271_v10 }
  0x8a   : > { %v269_v12 = vpop.permute.xlu1 %268  ;;  %v299_v13 = vpop.permute.xlu0 %298  ;;  %v325_v14 = vld [vmem:[#allocation2 + $0x70] sm:$0xf] }
  0x8b   : > { %v274_v15 = vsel %vm272_vm2, %v269_v12, %v271_v10  ;;  %v303_v16 = vsel %vm302_vm3, %v297_v9, %v299_v13  ;;  %v304_v17 = vsel %vm302_vm3, %v299_v13, %v301_v8  ;;  %564 = vmatpush3.msk.msra.mxu1 %vm330_vm4, %v325_v14 }
  0x8c   : > { %279 = vst [vmem:[#allocation2 + $0x50] sm:$0xf] %v274_v15  ;;  %308 = vst [vmem:[#allocation2 + $0x60] sm:$0xf] %v303_v16  ;;  %565 = vmatprep.subr.mxu1 %v609_v0 }
  0x8d   : > { %309 = vst [vmem:[#allocation2 + $0x68] sm:$0xf] %v304_v17 }
  0x8e   : > { %v267_v18 = vpop.permute.xlu1 %266  ;;  %v286_v19 = vpop.permute.xlu0 %285 }
  0x8f   : > { %v273_v20 = vsel %vm272_vm2, %v267_v18, %v269_v12  ;;  %v289_v21 = vsel %vm287_vm6, %v284_v11, %v286_v19  ;;  %295 = vst.msk [vmem:[#allocation2 + $0x58] sm:$0xf0] %vm204_vm5, %v286_v19 }
  0x90   : > { %278 = vst [vmem:[#allocation2 + $0x48] sm:$0xf] %v273_v20  ;;  %294 = vst [vmem:[#allocation2 + $0x50] sm:$0xf0] %v289_v21 }
  0x92   : > { %v239_v22 = vpop.permute.xlu1 %238  ;;  %v282_v23 = vpop.permute.xlu0 %281 }
  0x93   : > { %v288_v24 = vsel %vm287_vm6, %v282_v23, %v284_v11  ;;  %v323_v26 = vld [vmem:[#allocation2 + $0x60] sm:$0xf] }
  0x94   : > { %v324_v25 = vld [vmem:[#allocation2 + $0x68] sm:$0xf]  ;;  %293 = vst [vmem:[#allocation2 + $0x48] sm:$0xf0] %v288_v24 }
  0x95   : > { %550 = vmatprep.subr.msk.mxu0 %vm330_vm4, %v324_v25 }
  0x96   : > { %551 = vmatpush1.msk.msra.mxu0 %vm330_vm4, %v323_v26  ;;  %v254_v27 = vpop.permute.xlu1 %253  ;;  %v241_v28 = vpop.permute.xlu0 %240  ;;  %v322_v29 = vld [vmem:[#allocation2 + $0x58] sm:$0xff] }
  0x97   : > { %v244_v30 = vsel %vm242_vm7, %v239_v22, %v241_v28  ;;  %250 = vst.msk [vmem:[#allocation2 + $0x40] sm:$0xf] %vm186_vm0, %v241_v28  ;;  %566 = vmatpush3.msra.mxu1 %v322_v29  ;;  %v321_v31 = vld [vmem:[#allocation2 + $0x50] sm:$0xff] }
  0x98   : > { %249 = vst [vmem:[#allocation2 + $0x38] sm:$0xf] %v244_v30  ;;  %364 = vmatprep.subr.mxu0 %v321_v31  ;;  %567 = vmatprep.subr.mxu1 %v609_v0 }
  0x9a   : > { %v237_v32 = vpop.permute.xlu1 %236  ;;  %v256_v33 = vpop.permute.xlu0 %255 }
  0x9b   : > { %v243_v34 = vsel %vm242_vm7, %v237_v32, %v239_v22  ;;  %v259_v35 = vsel %vm257_vm8, %v254_v27, %v256_v33  ;;  %265 = vst.msk [vmem:[#allocation2 + $0x40] sm:$0xf0] %vm204_vm5, %v256_v33  ;;  %v320_v36 = vld [vmem:[#allocation2 + $0x48] sm:$0xff] }
  0x9c   : > { %248 = vst [vmem:[#allocation2 + $0x30] sm:$0xf] %v243_v34  ;;  %264 = vst [vmem:[#allocation2 + $0x38] sm:$0xf0] %v259_v35  ;;  %365 = vmatpush1.msra.mxu0 %v320_v36 }
  0x9e   : > { %v209_v37 = vpop.permute.xlu1 %208  ;;  %v252_v38 = vpop.permute.xlu0 %251 }
  0x9f   : > { %v258_v39 = vsel %vm257_vm8, %v252_v38, %v254_v27 }
  0xa0   : > { %263 = vst [vmem:[#allocation2 + $0x30] sm:$0xf0] %v258_v39 }
  0xa2   : > { %v224_v40 = vpop.permute.xlu1 %223  ;;  %v211_v41 = vpop.permute.xlu0 %210  ;;  %v319_v42 = vld [vmem:[#allocation2 + $0x40] sm:$0xff] }
  0xa3   : > { %v214_v43 = vsel %vm212_vm9, %v209_v37, %v211_v41  ;;  %220 = vst.msk [vmem:[#allocation2 + $0x28] sm:$0xf] %vm186_vm0, %v211_v41  ;;  %568 = vmatpush3.msra.mxu1 %v319_v42  ;;  %v318_v44 = vld [vmem:[#allocation2 + $0x38] sm:$0xff] }
  0xa4   : > { %219 = vst [vmem:[#allocation2 + $0x20] sm:$0xf] %v214_v43  ;;  %366 = vmatprep.subr.mxu0 %v318_v44  ;;  %569 = vmatprep.subr.mxu1 %v609_v0 }
  0xa6   : > { %v207_v45 = vpop.permute.xlu1 %206  ;;  %v226_v46 = vpop.permute.xlu0 %225 }
  0xa7   : > { %v213_v47 = vsel %vm212_vm9, %v207_v45, %v209_v37  ;;  %v229_v48 = vsel %vm227_vm10, %v224_v40, %v226_v46  ;;  %235 = vst.msk [vmem:[#allocation2 + $0x28] sm:$0xf0] %vm204_vm5, %v226_v46  ;;  %v317_v49 = vld [vmem:[#allocation2 + $0x30] sm:$0xff] }
  0xa8   : > { %218 = vst [vmem:[#allocation2 + $0x18] sm:$0xf] %v213_v47  ;;  %234 = vst [vmem:[#allocation2 + $0x20] sm:$0xf0] %v229_v48  ;;  %367 = vmatpush1.msra.mxu0 %v317_v49 }
  0xaa   : > { %v193_v50 = vpop.permute.xlu1 %192  ;;  %v222_v51 = vpop.permute.xlu0 %221 }
  0xab   : > { %v228_v52 = vsel %vm227_vm10, %v222_v51, %v224_v40 }
  0xac   : > { %233 = vst [vmem:[#allocation2 + $0x18] sm:$0xf0] %v228_v52 }
  0xae   : > { %v191_v53 = vpop.permute.xlu1 %190  ;;  %v195_v54 = vpop.permute.xlu0 %194  ;;  %v316_v55 = vld [vmem:[#allocation2 + $0x28] sm:$0xff] }
  0xaf   : > { %v197_v56 = vsel %vm196_vm11, %v191_v53, %v193_v50  ;;  %v198_v57 = vsel %vm196_vm11, %v193_v50, %v195_v54  ;;  %205 = vst.msk [vmem:[#allocation2 + $0x10] sm:$0xf0] %vm204_vm5, %v195_v54  ;;  %570 = vmatpush3.msra.mxu1 %v316_v55  ;;  %v315_v58 = vld [vmem:[#allocation2 + $0x20] sm:$0xff] }
  0xb0   : > { %202 = vst [vmem:[#allocation2] sm:$0xf0] %v197_v56  ;;  %203 = vst [vmem:[#allocation2 + $0x8] sm:$0xf0] %v198_v57  ;;  %368 = vmatprep.subr.mxu0 %v315_v58  ;;  %571 = vmatprep.subr.mxu1 %v609_v0 }
  0xb3   : > { %v314_v59 = vld [vmem:[#allocation2 + $0x18] sm:$0xff] }
  0xb4   : > { %369 = vmatpush1.msra.mxu0 %v314_v59 }
  0xb6   : > { %v313_v61 = vld [vmem:[#allocation2 + $0x10] sm:$0xff] }
  0xb7   : > { %572 = vmatpush3.msra.mxu1 %v313_v61  ;;  %v312_v62 = vld [vmem:[#allocation2 + $0x8] sm:$0xff]  ;;  %v311_v63 = vld [vmem:[#allocation2] sm:$0xff] }
  0xb8   : > { %370 = vmatprep.subr.mxu0 %v312_v62  ;;  %574 = vmatmul.mubr.msk.f32.vlgmr.msra.gmra.mxu1 %vm326_vm12, %v171_v60 }
  0xb9   : > { %371 = vmatpush1.msra.mxu0 %v311_v63 }
  0xba   : > { %552 = vmatmul.mubr.msk.f32.vlgmr.msra.gmra.mxu0 %vm326_vm12, %v171_v60 }
  0xbb   : > { %v176_v2 = vpop.permute.xlu0 %175 }
 0x178   : > { %v477_v1 = vpop.f32.mrf.mxu1 }
 0x179   : > { %v483_v0 = vadd.f32 %v477_v1, %v176_v2 }
 0x17a   : > { %v406_v3 = vpop.f32.mrf.mxu0  ;;  %v575_v4 = vpop.f32.mrf.mxu1 }
 0x17b   : > { %v481_v5 = vadd.f32 %v406_v3, %v176_v2  ;;  %487 = vst.msk [vmem:[%s170_s6 + $0x10] sm:$0xff] %vm486_vm13, %v483_v0 }
 0x17c   : > { %v408_v6 = vpop.f32.mrf.mxu0 }
 0x17d   : > { %484 = vst [vmem:[%s170_s6] sm:$0xff] %v481_v5  ;;  %v482_v7 = vadd.f32 %v408_v6, %v176_v2 }
 0x17f   : > { %485 = vst [vmem:[%s170_s6 + $0x8] sm:$0xff] %v482_v7 }
 0x180 PF: > { %s13_s12 = sadd.s32 1, %s607_s12  }
 0x181   : > { %p10_p4 = scmp.ge.s32.totalorder %s13_s12, 4  }
 0x183   :  { %12 = sbr.rel (!%p10_p4) target bundleno = 1 (0x1), region = 62 }

</bundles_post_ra>
